<compile_context>
chip_gen: v7x
topology: tpu7x:2x2x1
jax: 0.10.0
libtpu: 0.0.40
codegen_flags: <defaults>
</compile_context>

<pallas_src>
import functools

import jax
import jax.numpy as jnp
import numpy as np
from jax.experimental import pallas as pl
from jax.experimental.pallas import tpu as pltpu


# ------------------------------ helpers ------------------------------------ #

def _round_up(v, m):
    return (v + m - 1) // m * m


def _use_accum(cin):
    # Deep-K concat only pays off when Cin alone would starve the MXU.
    return cin >= 32


@functools.lru_cache(maxsize=None)
def _vmem_capacity_bytes():
    try:
        return int(pltpu.get_tpu_info().vmem_capacity_bytes)
    except Exception:
        return 64 * 1024 * 1024          # conservative (v7x per-core VMEM)


def _budgets():
    cap = _vmem_capacity_bytes()
    tile_budget = min(cap // 3, 40 * 1024 * 1024)          # per-step work set
    vmem_limit = max(32 * 1024 * 1024,
                     min(cap * 3 // 4, 100 * 1024 * 1024))  # scoped VMEM limit
    return tile_budget, vmem_limit


def _step_vmem_bytes(th, w, cin, cout):
    """Rough per-grid-step VMEM footprint (bytes), incl. the im2col blow-up."""
    lanes = th * w
    lp = _round_up((th + 2) * w + 2, 128)
    window = 2 * cin * lp * 4                    # double-buffered DMA window
    outbuf = 2 * cout * lanes * 4                # pipelined output blocks
    params = 2 * (cout * 9 * cin + 2 * lanes + cout) * 4
    if _use_accum(cin):
        work = (cin + 2 * cout) * lanes * 4      # one tap + f32 accumulator
    else:
        work = (9 * cin + cout) * lanes * 4      # materialized im2col
    return window + outbuf + params + work


def _choose_row_tile(h, w, cin, cout, budget):
    """Largest row tile with lane-dense (128-multiple) TH*W that fits VMEM."""
    cands = [th for th in range(1, h + 1)
             if h % th == 0 and (th * w) % 128 == 0]
    if not cands:
        # No lane-dense tiling divides H: whole-image block is the only other
        # legal BlockSpec (block == full array dims).  Masked stores, but rare.
        return h

    def score(th):
        lanes = th * w
        fits = _step_vmem_bytes(th, w, cin, cout) <= budget
        return (fits, (h // th) >= 2, lanes if fits else -lanes)

    return max(cands, key=score)


# ------------------------------ Pallas kernel ------------------------------ #

def _ecb_rep3x3_kernel(x_hbm, w_ref, b_ref, m_ref, o_ref, xbuf, sem,
                       *, th, w, lp):
    """One (batch, cout-block, row-tile) step of the reparameterized 3x3 conv.

    x_hbm : (N, Cin, GLEN)   padded + row-flattened input, resident in HBM.
    w_ref : (CoB, 9*Cin)     merged 3x3 weights (tap-major along 9*Cin).
    b_ref : (CoB, 1)         merged bias.
    m_ref : (2, TH*W)        resident column masks: row0 col!=0, row1 col!=W-1.
    o_ref : (1, CoB, TH*W)   output row tile (lane-dense last dim).
    xbuf  : (2, Cin, LP)     double-buffered window scratch (VMEM).
    sem   : (2,)             DMA semaphores.
    """
    lanes = th * w
    b = pl.program_id(0)
    t = pl.program_id(2)
    nt = pl.num_programs(2)
    slot = jax.lax.rem(t, 2)

    def window_copy(ti, sl):
        start = ti * lanes
        return pltpu.make_async_copy(
            x_hbm.at[b, :, pl.ds(start, lp)], xbuf.at[sl], sem.at[sl])

    # Prime the pipeline at the start of every (batch, cout-block) row sweep.
    @pl.when(t == 0)
    def _():
        window_copy(0, 0).start()

    # Wait for the current tile's window, then prefetch the next one so the
    # input DMA overlaps this step's compute.
    window_copy(t, slot).wait()

    @pl.when(t + 1 < nt)
    def _():
        window_copy(t + 1, 1 - slot).start()

    x = xbuf[slot]                     # (Cin, LP)  single hoisted load
    wmat = w_ref[...]                  # (CoB, 9*Cin)
    bias = b_ref[...]                  # (CoB, 1)
    masks = m_ref[...]                 # (2, lanes) -- hoisted, resident
    not_left = masks[0:1, :]
    not_right = masks[1:2, :]

    cin = x.shape[0]

    def tap(ty, tx):
        s = ty * w + tx                # static slice start within the window
        v = x[:, s:s + lanes]          # (Cin, lanes)
        if tx == 0:
            v = v * not_left           # zero the left-padding column reads
        elif tx == 2:
            v = v * not_right          # zero the right-padding column reads
        return v

    taps = [(ty, tx) for ty in range(3) for tx in range(3)]
    if _use_accum(cin):
        # Large Cin: accumulate nine Cin-deep matmuls; never materialize the
        # 9x (9*Cin, lanes) im2col copy (keeps v7x's 64 MiB VMEM happy).
        acc = None
        for k, (ty, tx) in enumerate(taps):
            part = jnp.dot(wmat[:, k * cin:(k + 1) * cin], tap(ty, tx),
                           preferred_element_type=jnp.float32)
            acc = part if acc is None else acc + part
        out = acc + bias
    else:
        # Tiny Cin: one deep-K (9*Cin) matmul keeps the MXU contraction deep.
        patches = jnp.concatenate([tap(ty, tx) for ty, tx in taps], axis=0)
        out = jnp.dot(wmat, patches,
                      preferred_element_type=jnp.float32) + bias
    o_ref[0] = out.astype(o_ref.dtype)


# ------------------------------ host wrapper -------------------------------- #

@functools.partial(jax.jit, static_argnames=("th", "n_co", "vmem_limit"))
def _ecb_rep3x3(x_nchw, w_mat, rb, *, th, n_co, vmem_limit):
    """y[n,o] = sum_{tap,c} RK[o,tap,c] * xpad[n,c] + RB[o]  (3x3 'same')."""
    n, cin, h, w = x_nchw.shape
    cout = w_mat.shape[0]
    nt = h // th
    lanes = th * w
    lp = _round_up((th + 2) * w + 2, 128)
    glen = (nt - 1) * lanes + lp
    lead = 1 + w                              # 1 guard lane + top zero row
    tail = glen - lead - h * w                # >= bottom zero row + guard

    # Pad + flatten ONCE (contiguous; no gather, no halo duplication): lane
    # (lead + k) of xg holds pixel k of the row-major image; the vertical zero
    # padding and the DMA-window guard lanes all come from this single pad.
    xg = jnp.pad(x_nchw.astype(jnp.float32).reshape(n, cin, h * w),
                 ((0, 0), (0, 0), (lead, tail)))

    # Horizontal-padding column masks, hoisted out of the kernel (resident).
    col = np.arange(lanes) % w
    masks = jnp.asarray(np.stack([col != 0, col != (w - 1)]).astype(np.float32))

    co_blk = cout // n_co
    kern = functools.partial(_ecb_rep3x3_kernel, th=th, w=w, lp=lp)
    y = pl.pallas_call(
        kern,
        out_shape=jax.ShapeDtypeStruct((n, cout, h * w), jnp.float32),
        grid_spec=pltpu.PrefetchScalarGridSpec(
            num_scalar_prefetch=0,
            grid=(n, n_co, nt),
            in_specs=[
                pl.BlockSpec(memory_space=pl.ANY),               # x stays in HBM
                pl.BlockSpec((co_blk, 9 * cin), lambda b, j, t: (j, 0)),
                pl.BlockSpec((co_blk, 1), lambda b, j, t: (j, 0)),
                pl.BlockSpec((2, lanes), lambda b, j, t: (0, 0)),
            ],
            out_specs=pl.BlockSpec((1, co_blk, lanes),
                                   lambda b, j, t: (b, j, t)),
            scratch_shapes=[
                pltpu.VMEM((2, cin, lp), jnp.float32),
                pltpu.SemaphoreType.DMA((2,)),
            ],
        ),
        compiler_params=pltpu.CompilerParams(
            dimension_semantics=("parallel", "parallel", "arbitrary"),
            vmem_limit_bytes=vmem_limit,
        ),
    )(xg, w_mat, rb, masks)
    # Pure reshape: no transpose round-trip on the output.
    return y.reshape(n, cout, h, w)


# ------------------------------- Module glue -------------------------------- #

class SeqConv3x3:
    """JAX/Pallas port of the PyTorch SeqConv3x3 module (forward only)."""

    def __init__(self, seq_type, inp_planes, out_planes, depth_multiplier=1.0,
                 key=None):
        if key is None:
            key = jax.random.PRNGKey(0)
        self.type = seq_type
        self.inp_planes = inp_planes
        self.out_planes = out_planes
        ks = jax.random.split(key, 4)

        if seq_type == 'conv1x1-conv3x3':
            self.mid_planes = int(out_planes * depth_multiplier)
            # torch k0: (mid, inp, 1, 1) -> stored as (inp, mid)
            self.k0 = jax.random.normal(ks[0], (inp_planes, self.mid_planes),
                                        jnp.float32) * 0.1
            self.b0 = jax.random.normal(ks[1], (1, self.mid_planes),
                                        jnp.float32) * 0.1
            # torch k1: (out, mid, 3, 3) -> stored tap-major as (9, mid, out)
            self.k1 = jax.random.normal(ks[2], (9, self.mid_planes, out_planes),
                                        jnp.float32) * 0.1
            self.b1 = jax.random.normal(ks[3], (1, out_planes), jnp.float32) * 0.1
            # Exact reparameterization (same identity as torch rep_params):
            rk = jnp.einsum('cm,tmo->tco', self.k0, self.k1)          # (9,Cin,Cout)
            rb = jnp.einsum('m,tmo->o', self.b0[0], self.k1) + self.b1[0]
        elif seq_type in ('conv1x1-sobelx', 'conv1x1-sobely', 'conv1x1-laplacian'):
            self.mid_planes = out_planes
            # torch k0: (out, inp, 1, 1) -> stored as (inp, out)
            self.k0 = jax.random.normal(ks[0], (inp_planes, out_planes),
                                        jnp.float32) * 0.1
            self.b0 = jax.random.normal(ks[1], (1, out_planes), jnp.float32) * 0.1
            scale = jax.random.normal(ks[2], (out_planes, 1, 1), jnp.float32) * 0.001
            self.bias = jax.random.normal(ks[3], (1, out_planes), jnp.float32) * 0.001
            mask = np.zeros((out_planes, 3, 3), np.float32)   # (out, ky, kx)
            if seq_type == 'conv1x1-sobelx':
                mask[:, 0, 0] = 1.0; mask[:, 1, 0] = 2.0; mask[:, 2, 0] = 1.0
                mask[:, 0, 2] = -1.0; mask[:, 1, 2] = -2.0; mask[:, 2, 2] = -1.0
            elif seq_type == 'conv1x1-sobely':
                mask[:, 0, 0] = 1.0; mask[:, 0, 1] = 2.0; mask[:, 0, 2] = 1.0
                mask[:, 2, 0] = -1.0; mask[:, 2, 1] = -2.0; mask[:, 2, 2] = -1.0
            else:  # laplacian
                mask[:, 0, 1] = 1.0; mask[:, 1, 0] = 1.0; mask[:, 1, 2] = 1.0
                mask[:, 2, 1] = 1.0; mask[:, 1, 1] = -4.0
            eff = jnp.asarray(mask) * scale                    # (out, ky, kx)
            self.eff = jnp.transpose(eff, (1, 2, 0)).reshape(9, out_planes)
            # Depthwise reparameterization: RK[tap, c, o] = k0[c, o] * eff[tap, o]
            rk = jnp.einsum('co,to->tco', self.k0, self.eff)
            rb = self.b0[0] * jnp.sum(self.eff, axis=0) + self.bias[0]
        else:
            raise ValueError('the type of seqconv is not supported!')

        # Kernel weight layout: (Cout, 9*Cin), tap-major along 9*Cin to match
        # the in-kernel tap order; bias as (Cout, 1) for a lane broadcast.
        self.w_mat = jnp.transpose(rk, (2, 0, 1)).reshape(out_planes,
                                                          9 * inp_planes)
        self.rb = rb.reshape(out_planes, 1)

    def __call__(self, x_nchw):
        n, _, h, w = x_nchw.shape
        tile_budget, vmem_limit = _budgets()
        th = _choose_row_tile(h, w, self.inp_planes, self.out_planes,
                              tile_budget)
        nt = h // th
        n_co = 1
        if n * nt < 2 and self.out_planes % 16 == 0:
            n_co = 2     # keep both v7x TensorCores busy on a 1-tile grid
        return _ecb_rep3x3(x_nchw, self.w_mat, self.rb,
                           th=th, n_co=n_co, vmem_limit=vmem_limit)


# ---------------------------- pure-JAX reference ---------------------------- #
# Implements the ORIGINAL (un-fused) two-stage semantics, including the b0
# border-ring overwrite, as an independent check of the reparameterized kernel.

def seqconv_reference(mod, x_nchw):
    x = jnp.transpose(x_nchw, (0, 2, 3, 1)).astype(jnp.float32)
    N, H, W, _ = x.shape
    b0 = mod.b0.reshape(1, 1, 1, -1)
    y0 = jnp.einsum('nhwc,cm->nhwm', x, mod.k0) + b0
    y0p = jnp.pad(y0, ((0, 0), (1, 1), (1, 1), (0, 0)))
    y0p = y0p.at[:, 0:1, :, :].set(b0)
    y0p = y0p.at[:, -1:, :, :].set(b0)
    y0p = y0p.at[:, :, 0:1, :].set(b0)
    y0p = y0p.at[:, :, -1:, :].set(b0)
    if mod.type == 'conv1x1-conv3x3':
        out = jnp.broadcast_to(mod.b1.reshape(1, 1, 1, -1),
                               (N, H, W, mod.out_planes))
        for dy in range(3):
            for dx in range(3):
                out = out + jnp.einsum('nhwm,mo->nhwo',
                                       y0p[:, dy:dy + H, dx:dx + W, :],
                                       mod.k1[dy * 3 + dx])
    else:
        out = jnp.broadcast_to(mod.bias.reshape(1, 1, 1, -1),
                               (N, H, W, mod.out_planes))
        for dy in range(3):
            for dx in range(3):
                out = out + (y0p[:, dy:dy + H, dx:dx + W, :]
                             * mod.eff[dy * 3 + dx].reshape(1, 1, 1, -1))
    return jnp.transpose(out, (0, 3, 1, 2))


# ----------------------------------- main ----------------------------------- #

if __name__ == "__main__":
    key = jax.random.PRNGKey(0)
    kx, kp = jax.random.split(key)
    N, Cin, H, W = 2, 4, 16, 16
    Cout = 8
    x = jax.random.normal(kx, (N, Cin, H, W), jnp.float32)

    all_ok = True
    for seq_type in ('conv1x1-conv3x3', 'conv1x1-sobelx',
                     'conv1x1-sobely', 'conv1x1-laplacian'):
        mod = SeqConv3x3(seq_type, Cin, Cout, depth_multiplier=1.0, key=kp)
        y = jax.block_until_ready(mod(x))
        y_ref = jax.block_until_ready(seqconv_reference(mod, x))
        assert y.shape == (N, Cout, H, W), (seq_type, y.shape)
        ok = np.allclose(np.asarray(y), np.asarray(y_ref), rtol=1e-4, atol=1e-5)
        if not ok:
            print(f"mismatch for {seq_type}: "
                  f"max_abs_err={np.max(np.abs(np.asarray(y) - np.asarray(y_ref)))}")
        all_ok = all_ok and ok

    if all_ok:
        print("KERNEL_OK")
</pallas_src>

<mosaic_0001>
module attributes {stable_mosaic.version = 11 : i64} {
  func.func @_ecb_rep3x3_kernel(%arg0: i32, %arg1: i32, %arg2: i32, %arg3: memref<2x4x384xf32, #tpu.memory_space<any>>, %arg4: memref<8x36xf32, #tpu.memory_space<vmem>>, %arg5: memref<8x1xf32, #tpu.memory_space<vmem>>, %arg6: memref<2x128xf32, #tpu.memory_space<vmem>>, %arg7: memref<1x8x128xf32, #tpu.memory_space<vmem>>, %arg8: memref<2x4x256xf32, #tpu.memory_space<vmem>>, %arg9: memref<2x!tpu.dma_semaphore, #tpu.memory_space<semaphore_mem>>) attributes {dimension_semantics = [#tpu.dimension_semantics<parallel>, #tpu.dimension_semantics<parallel>, #tpu.dimension_semantics<arbitrary>], iteration_bounds = array<i64: 2, 1, 2>, scalar_prefetch = 0 : i64, scratch_operands = 2 : i64, tpu.core_type = #tpu.core_type<tc>, window_params = [{}, {transform_indices = @transform_1, window_bounds = array<i64: 8, 36>}, {transform_indices = @transform_2, window_bounds = array<i64: 8, 1>}, {pipeline_mode = #tpu.pipeline_mode<synchronous>, transform_indices = @transform_3, window_bounds = array<i64: 2, 128>}, {transform_indices = @transform_4, window_bounds = array<i64: 1, 8, 128>}]} {
    %c2_i32 = arith.constant 2 : i32
    %0 = arith.remsi %arg2, %c2_i32 : i32
    %c0_i32 = arith.constant 0 : i32
    %1 = arith.cmpi eq, %arg2, %c0_i32 : i32
    %2 = arith.extui %1 : i1 to i32
    %c0_i32_0 = arith.constant 0 : i32
    %3 = arith.cmpi ne, %2, %c0_i32_0 : i32
    scf.if %3 {
      %c0_i32_16 = arith.constant 0 : i32
      %c0_i32_17 = arith.constant 0 : i32
      %c0_i32_18 = arith.constant 0 : i32
      %c0_i32_19 = arith.constant 0 : i32
      %51 = tpu.memref_slice %arg3[%arg0, %c0_i32_18, %c0_i32_19] : memref<2x4x384xf32, #tpu.memory_space<any>> -> memref<1x4x256xf32, #tpu.memory_space<any>>
      %52 = tpu.memref_squeeze %51 : memref<1x4x256xf32, #tpu.memory_space<any>> -> memref<4x256xf32, #tpu.memory_space<any>>
      %c0_i32_20 = arith.constant 0 : i32
      %c0_i32_21 = arith.constant 0 : i32
      %53 = tpu.memref_slice %arg8[%c0_i32_16, %c0_i32_20, %c0_i32_21] : memref<2x4x256xf32, #tpu.memory_space<vmem>> -> memref<1x4x256xf32, #tpu.memory_space<vmem>>
      %54 = tpu.memref_squeeze %53 : memref<1x4x256xf32, #tpu.memory_space<vmem>> -> memref<4x256xf32, #tpu.memory_space<vmem>>
      %55 = tpu.memref_slice %arg9[%c0_i32_17] : memref<2x!tpu.dma_semaphore, #tpu.memory_space<semaphore_mem>> -> memref<1x!tpu.dma_semaphore, #tpu.memory_space<semaphore_mem>>
      %56 = tpu.memref_squeeze %55 : memref<1x!tpu.dma_semaphore, #tpu.memory_space<semaphore_mem>> -> memref<!tpu.dma_semaphore, #tpu.memory_space<semaphore_mem>>
      tpu.enqueue_dma source(%52 : memref<4x256xf32, #tpu.memory_space<any>>) target(%54 : memref<4x256xf32, #tpu.memory_space<vmem>>) target_semaphore(%56 : memref<!tpu.dma_semaphore, #tpu.memory_space<semaphore_mem>>)
    } else {
    }
    %c128_i32 = arith.constant 128 : i32
    %4 = arith.muli %arg2, %c128_i32 : i32
    %c0_i32_1 = arith.constant 0 : i32
    %5 = tpu.memref_slice %arg3[%arg0, %c0_i32_1, %4] : memref<2x4x384xf32, #tpu.memory_space<any>> -> memref<1x4x256xf32, #tpu.memory_space<any>>
    %6 = tpu.memref_squeeze %5 : memref<1x4x256xf32, #tpu.memory_space<any>> -> memref<4x256xf32, #tpu.memory_space<any>>
    %c0_i32_2 = arith.constant 0 : i32
    %c0_i32_3 = arith.constant 0 : i32
    %7 = tpu.memref_slice %arg8[%0, %c0_i32_2, %c0_i32_3] : memref<2x4x256xf32, #tpu.memory_space<vmem>> -> memref<1x4x256xf32, #tpu.memory_space<vmem>>
    %8 = tpu.memref_squeeze %7 : memref<1x4x256xf32, #tpu.memory_space<vmem>> -> memref<4x256xf32, #tpu.memory_space<vmem>>
    %9 = tpu.memref_slice %arg9[%0] : memref<2x!tpu.dma_semaphore, #tpu.memory_space<semaphore_mem>> -> memref<1x!tpu.dma_semaphore, #tpu.memory_space<semaphore_mem>>
    %10 = tpu.memref_squeeze %9 : memref<1x!tpu.dma_semaphore, #tpu.memory_space<semaphore_mem>> -> memref<!tpu.dma_semaphore, #tpu.memory_space<semaphore_mem>>
    tpu.wait_dma2 semaphore(%10 : memref<!tpu.dma_semaphore, #tpu.memory_space<semaphore_mem>>) src(%6 : memref<4x256xf32, #tpu.memory_space<any>>) dst(%8 : memref<4x256xf32, #tpu.memory_space<vmem>>)
    %c1_i32 = arith.constant 1 : i32
    %11 = arith.addi %arg2, %c1_i32 : i32
    %c2_i32_4 = arith.constant 2 : i32
    %12 = arith.cmpi slt, %11, %c2_i32_4 : i32
    %13 = arith.extui %12 : i1 to i32
    %c0_i32_5 = arith.constant 0 : i32
    %14 = arith.cmpi ne, %13, %c0_i32_5 : i32
    scf.if %14 {
      %c1_i32_16 = arith.constant 1 : i32
      %51 = arith.addi %arg2, %c1_i32_16 : i32
      %c1_i32_17 = arith.constant 1 : i32
      %52 = arith.subi %c1_i32_17, %0 : i32
      %c128_i32_18 = arith.constant 128 : i32
      %53 = arith.muli %51, %c128_i32_18 : i32
      %c0_i32_19 = arith.constant 0 : i32
      %54 = tpu.memref_slice %arg3[%arg0, %c0_i32_19, %53] : memref<2x4x384xf32, #tpu.memory_space<any>> -> memref<1x4x256xf32, #tpu.memory_space<any>>
      %55 = tpu.memref_squeeze %54 : memref<1x4x256xf32, #tpu.memory_space<any>> -> memref<4x256xf32, #tpu.memory_space<any>>
      %c0_i32_20 = arith.constant 0 : i32
      %c0_i32_21 = arith.constant 0 : i32
      %56 = tpu.memref_slice %arg8[%52, %c0_i32_20, %c0_i32_21] : memref<2x4x256xf32, #tpu.memory_space<vmem>> -> memref<1x4x256xf32, #tpu.memory_space<vmem>>
      %57 = tpu.memref_squeeze %56 : memref<1x4x256xf32, #tpu.memory_space<vmem>> -> memref<4x256xf32, #tpu.memory_space<vmem>>
      %58 = tpu.memref_slice %arg9[%52] : memref<2x!tpu.dma_semaphore, #tpu.memory_space<semaphore_mem>> -> memref<1x!tpu.dma_semaphore, #tpu.memory_space<semaphore_mem>>
      %59 = tpu.memref_squeeze %58 : memref<1x!tpu.dma_semaphore, #tpu.memory_space<semaphore_mem>> -> memref<!tpu.dma_semaphore, #tpu.memory_space<semaphore_mem>>
      tpu.enqueue_dma source(%55 : memref<4x256xf32, #tpu.memory_space<any>>) target(%57 : memref<4x256xf32, #tpu.memory_space<vmem>>) target_semaphore(%59 : memref<!tpu.dma_semaphore, #tpu.memory_space<semaphore_mem>>)
    } else {
    }
    %15 = arith.index_cast %0 : i32 to index
    %c0 = arith.constant 0 : index
    %c0_6 = arith.constant 0 : index
    %16 = vector.load %arg8[%15, %c0, %c0_6] : memref<2x4x256xf32, #tpu.memory_space<vmem>>, vector<1x4x256xf32>
    %17 = vector.shape_cast %16 : vector<1x4x256xf32> to vector<4x256xf32>
    %c0_7 = arith.constant 0 : index
    %c0_8 = arith.constant 0 : index
    %18 = vector.load %arg4[%c0_7, %c0_8] : memref<8x36xf32, #tpu.memory_space<vmem>>, vector<8x36xf32>
    %c0_9 = arith.constant 0 : index
    %c0_10 = arith.constant 0 : index
    %19 = vector.load %arg5[%c0_9, %c0_10] : memref<8x1xf32, #tpu.memory_space<vmem>>, vector<8x1xf32>
    %c0_11 = arith.constant 0 : index
    %c0_12 = arith.constant 0 : index
    %20 = vector.load %arg6[%c0_11, %c0_12] : memref<2x128xf32, #tpu.memory_space<vmem>>, vector<2x128xf32>
    %21 = vector.extract_strided_slice %20 {offsets = [0, 0], sizes = [1, 128], strides = [1, 1]} : vector<2x128xf32> to vector<1x128xf32>
    %22 = vector.extract_strided_slice %20 {offsets = [1, 0], sizes = [1, 128], strides = [1, 1]} : vector<2x128xf32> to vector<1x128xf32>
    %23 = vector.extract_strided_slice %17 {offsets = [0, 0], sizes = [4, 128], strides = [1, 1]} : vector<4x256xf32> to vector<4x128xf32>
    %24 = vector.broadcast %21 : vector<1x128xf32> to vector<4x128xf32>
    %25 = arith.mulf %23, %24 : vector<4x128xf32>
    %26 = vector.extract_strided_slice %17 {offsets = [0, 1], sizes = [4, 128], strides = [1, 1]} : vector<4x256xf32> to vector<4x128xf32>
    %27 = vector.extract_strided_slice %17 {offsets = [0, 2], sizes = [4, 128], strides = [1, 1]} : vector<4x256xf32> to vector<4x128xf32>
    %28 = vector.broadcast %22 : vector<1x128xf32> to vector<4x128xf32>
    %29 = arith.mulf %27, %28 : vector<4x128xf32>
    %30 = vector.extract_strided_slice %17 {offsets = [0, 16], sizes = [4, 128], strides = [1, 1]} : vector<4x256xf32> to vector<4x128xf32>
    %31 = vector.broadcast %21 : vector<1x128xf32> to vector<4x128xf32>
    %32 = arith.mulf %30, %31 : vector<4x128xf32>
    %33 = vector.extract_strided_slice %17 {offsets = [0, 17], sizes = [4, 128], strides = [1, 1]} : vector<4x256xf32> to vector<4x128xf32>
    %34 = vector.extract_strided_slice %17 {offsets = [0, 18], sizes = [4, 128], strides = [1, 1]} : vector<4x256xf32> to vector<4x128xf32>
    %35 = vector.broadcast %22 : vector<1x128xf32> to vector<4x128xf32>
    %36 = arith.mulf %34, %35 : vector<4x128xf32>
    %37 = vector.extract_strided_slice %17 {offsets = [0, 32], sizes = [4, 128], strides = [1, 1]} : vector<4x256xf32> to vector<4x128xf32>
    %38 = vector.broadcast %21 : vector<1x128xf32> to vector<4x128xf32>
    %39 = arith.mulf %37, %38 : vector<4x128xf32>
    %40 = vector.extract_strided_slice %17 {offsets = [0, 33], sizes = [4, 128], strides = [1, 1]} : vector<4x256xf32> to vector<4x128xf32>
    %41 = vector.extract_strided_slice %17 {offsets = [0, 34], sizes = [4, 128], strides = [1, 1]} : vector<4x256xf32> to vector<4x128xf32>
    %42 = vector.broadcast %22 : vector<1x128xf32> to vector<4x128xf32>
    %43 = arith.mulf %41, %42 : vector<4x128xf32>
    %44 = tpu.concatenate %25, %26, %29, %32, %33, %36, %39, %40, %43 in 0 : vector<4x128xf32>, vector<4x128xf32>, vector<4x128xf32>, vector<4x128xf32>, vector<4x128xf32>, vector<4x128xf32>, vector<4x128xf32>, vector<4x128xf32>, vector<4x128xf32> -> vector<36x128xf32>
    %cst = arith.constant dense<0.000000e+00> : vector<8x128xf32>
    %45 = tpu.matmul %18, %44, %cst {dimension_numbers = #tpu.dot_dimension_numbers<[1], [0], [0], [1], [0, 0, 1, 1], [], []>} : vector<8x36xf32>, vector<36x128xf32>, vector<8x128xf32> -> vector<8x128xf32>
    %46 = vector.broadcast %19 : vector<8x1xf32> to vector<8x128xf32>
    %47 = arith.addf %45, %46 : vector<8x128xf32>
    %c0_13 = arith.constant 0 : index
    %c0_14 = arith.constant 0 : index
    %c0_15 = arith.constant 0 : index
    %48 = vector.load %arg7[%c0_13, %c0_14, %c0_15] : memref<1x8x128xf32, #tpu.memory_space<vmem>>, vector<1x8x128xf32>
    %49 = vector.shape_cast %48 : vector<1x8x128xf32> to vector<8x128xf32>
    %50 = vector.shape_cast %47 : vector<8x128xf32> to vector<1x8x128xf32>
    tpu.vector_store %arg7[%c0_13, %c0_14, %c0_15], %50 {strides = array<i32>} : memref<1x8x128xf32, #tpu.memory_space<vmem>>, vector<1x8x128xf32>,
    return
  }
  func.func @transform_1(%arg0: i32, %arg1: i32, %arg2: i32) -> (i32, i32) {
    %c0_i32 = arith.constant 0 : i32
    %c0_i32_0 = arith.constant 0 : i32
    return %arg1, %c0_i32 : i32, i32
  }
  func.func @transform_2(%arg0: i32, %arg1: i32, %arg2: i32) -> (i32, i32) {
    %c0_i32 = arith.constant 0 : i32
    %c0_i32_0 = arith.constant 0 : i32
    return %arg1, %c0_i32 : i32, i32
  }
  func.func @transform_3(%arg0: i32, %arg1: i32, %arg2: i32) -> (i32, i32) {
    %c0_i32 = arith.constant 0 : i32
    %c0_i32_0 = arith.constant 0 : i32
    %c0_i32_1 = arith.constant 0 : i32
    return %c0_i32, %c0_i32_0 : i32, i32
  }
  func.func @transform_4(%arg0: i32, %arg1: i32, %arg2: i32) -> (i32, i32, i32) {
    %c0_i32 = arith.constant 0 : i32
    return %arg0, %arg1, %arg2 : i32, i32, i32
  }
}

</mosaic_0001>

<bundles_post_ra>
// kernel: _ecb_rep3x3.1
= control target key start
LH: loop header
LB: loop body
LE: loop exit
PB: predicated region body
PF: predicated region fallthrough
CT: control target
= control target key end

     0   :  { %s942_s15 = smov 0   ;;  %s944_s16 = smov 0   ;;  %s1055_s0 = inlined_call_operand.vmem [shape: f32[2,4,384], index: 0, kind: input, shape index: {}]   ;;  %s1056_s1 = inlined_call_operand.vmem [shape: f32[8,36], index: 1, kind: input, shape index: {}]   ;;  %s1057_s2 = inlined_call_operand.vmem [shape: f32[8,1], index: 2, kind: input, shape index: {}]   ;;  %s1058_s3 = inlined_call_operand.vmem [shape: f32[2,128], index: 3, kind: input, shape index: {}]   ;;  %s1059_s4 = inlined_call_operand.vmem [shape: f32[2,8,256], index: 4, kind: output, shape index: {}]  }
   0x1   :  { %s946_s17 = smov 0   ;;  %s948_s18 = smov 0  }
   0x2   :  { %s950_s19 = smov 0  }
   0x3 LB: > { %s26_s20 = sadd.s32 1, %s890_s17  ;;  %s33_s21 = sadd.s32 1, %s894_s18  ;;  %s898_s19 = sphi %s950_s19, %s14_s19   ;;  %s894_s18 = sphi %s948_s18, %s1063_s18   ;;  %s890_s17 = sphi %s946_s17, %s1062_s17   ;;  %s886_s16 = sphi %s944_s16, %s1061_s16   ;;  %s882_s15 = sphi %s942_s15, %s1060_s15  }
   0x4   : > { %p27_p0 = scmp.ge.s32.totalorder %s26_s20, 2  ;;  %p714_p1 = scmp.ge.s32.totalorder %s898_s19, 1 }
   0x5   : > { %p169_p2 = scmp.lt.s32.totalorder %s898_s19, 5 }
   0x6   : > { %s1065_s20 = smov (%p27_p0, %s26_s20), 0  ;;  %s1067_s21 = smov (!%p27_p0, %s33_s21), %s894_s18 }
   0x7   : > { %p170_p3 = pnand %p714_p1, %p169_p2  ;;  %p35_p4 = scmp.ge.s32.totalorder %s1067_s21, 2 }
   0x8   : > { %p211_p5 = scmp.lt.s32.totalorder (!%p170_p3), %s886_s16, 1  ;;  %p215_p6 = scmp.lt.s32.totalorder (!%p170_p3), %s882_s15, 1 }
   0x9   : > { %s1069_s21 = smov (%p35_p4, %s1067_s21), 0  ;;  %173 = sbr.rel (%p170_p3) target bundleno = 527 (0x20f), region = 32 }
   0xa   : > { %p223_p7 = scmp.lt.s32.totalorder (!%p170_p3), %s882_s15, 0  ;;  %s224_s22 = ssub.s32 (!%p170_p3), 0, %s882_s15 }
   0xb   : > { %s717_s26 = smin.u32 (!%p170_p3), %s882_s15, %s224_s22  ;;  %p718_p8 = scmp.ne.s32.totalorder (!%p170_p3), %s882_s15, 0 }
   0xc   : > { %s226_s28 = sand.u32 (!%p170_p3), 1, %s717_s26  }
   0xd   : > { %s227_s30 = ssub.s32 (!%p170_p3), 0, %s226_s28 }
  0x10   : > { %s212_s23 = scalar_select %p211_p5, %s886_s16, 1 }
  0x11   : > { %s216_s24 = scalar_select %p215_p6, %s882_s15, 1 }
  0x12   : > { %s715_s25 = sshll.u32 %s212_s23, 1  ;;  %s1071_s30 = smov (!%p223_p7, %s227_s30), %s226_s28 }
  0x13   : > { %s220_s27 = sadd.s32 %s715_s25, %s216_s24  ;;  %232 = sbr.rel (%p718_p8) target bundleno = 27 (0x1b), region = 36 }
  0x14   : > { %s716_s29 = sshll.u32 %s220_s27, 3  ;;  %s733_s8 = smul.u32 (!%p718_p8), 12, %s886_s16 }
  0x15   : > { %s986_s7 = scalar_lea.vmem %s1059_s4, %s716_s29 }
  0x16   : > { %s235_s11 = scalar_lea.vmem (!%p718_p8), %s1055_s0, %s733_s8 }
  0x17   : > { %v268_v0 = vld [vmem:[%s235_s11] sm:$0xff] (!%p718_p8) }
  0x18   : > { %269 = vst [vmem:[#allocation2] sm:$0xff] (!%p718_p8), %v268_v0 }
  0x1a   : > { %277 = vsyncadd [#allocation3], 128 }
  0x1b PF: > { %s734_s12 = sshll.u32 %s1071_s30, 3  ;;  %s281_s14 = scalar_lea.sflag [#allocation3], %s1071_s30 }
  0x1c   : > { %s280_s13 = scalar_lea.vmem [#allocation2], %s734_s12 }
  0x1d   : > { %878 = dma.done.wait %s281_s14, 128 }
  0x1e   : > { %879 = vsyncadd %s281_s14, 4294967168  ;;  %s286_s22 = sadd.s32 1, %s882_s15 }
  0x1f   : > { %p722_p9 = scmp.ge.s32.totalorder %s286_s22, 2 }
  0x20   : > { %s291_s23 = ssub.s32 (!%p722_p9), 1, %s1071_s30  ;;  %s735_s24 = sshll.u32 (!%p722_p9), %s882_s15, 7 }
  0x21   : > { %290 = sbr.rel (%p722_p9) target bundleno = 42 (0x2a), region = 74  ;;  %s736_s25 = sadd.s32 (!%p722_p9), 128, %s735_s24 }
  0x22   : > { %s295_s26 = smul.u32 (!%p722_p9), 3, %s886_s16  ;;  %s293_s27 = sshra.s32 (!%p722_p9), %s736_s25, 7 }
  0x23   : > { %s737_s28 = sshll.u32 (!%p722_p9), %s291_s23, 3  ;;  %s302_s11 = scalar_lea.sflag (!%p722_p9), [#allocation3], %s291_s23 }
  0x24   : > { %s296_s29 = sadd.s32 (!%p722_p9), %s295_s26, %s293_s27  ;;  %s301_s10 = scalar_lea.vmem (!%p722_p9), [#allocation2], %s737_s28 }
  0x25   : > { %s724_s5 = sshll.u32 (!%p722_p9), %s296_s29, 2 }
  0x26   : > { %s298_s9 = scalar_lea.vmem (!%p722_p9), %s1055_s0, %s724_s5 }
  0x27   : > { %v335_v1 = vld [vmem:[%s298_s9] sm:$0xff] (!%p722_p9) }
  0x28   : > { %336 = vst [vmem:[%s301_s10] sm:$0xff] %v335_v1 }
  0x29   : > { %344 = vsyncadd %s302_s11, 128 }
  0x2a PF: > { %v349_v2 = vlaneseq  ;;  %v348_v4 = vld [vmem:[%s1058_s3] sm:$0x3]  ;;  %s900_s16 = smov 2   ;;  %s901_s12 = smov 18   ;;  %vm362_vm0 = vcmask 15360   ;;  %vm377_vm1 = vcmask 146432  }
  0x2b   : > { %s902_s14 = smov 16   ;;  %s903_s22 = smov 32   ;;  %vm370_vm2 = vcmask 130048   ;;  %vm384_vm3 = vcmask 261120   ;;  %v907_v26 = vmov 0.0|0.0   ;;  %vm391_vm4 = vcmask 277504  }
  0x2c   : > { %v350_v3 = vshrl.u32 %v349_v2, 7  ;;  %s905_s23 = smov 127   ;;  %s906_s24 = smov 111   ;;  %757 = vmatprep.subr.bf16.mxu0 %v907_v26  ;;  %vm913_vm5 = vmmov 0   ;;  %v914_v43 = vmov 0.0   ;;  %v347_v44 = vld [vmem:[%s1057_s2] sm:$0xff] }
  0x2d   : > { %s908_s25 = smov 126   ;;  %s909_s26 = smov 112   ;;  %754 = vmatprep.mubr.msk.f32.mxu0 %vm913_vm5, %v914_v43  ;;  %v915_v45 = vmov 0   ;;  %vm401_vm6 = vcmask 1039360   ;;  %vm410_vm7 = vcmask 1031168   ;;  %vm419_vm8 = vcmask 916480  }
  0x2e   : > { %v356_v5 = vsub.s32 1, %v350_v3  ;;  %v351_v6 = vsub.s32 0, %v350_v3  ;;  %s910_s27 = smov 96   ;;  %s911_s28 = smov 110   ;;  %855 = vset.pattern.permute.xlu0 %v915_v45  ;;  %vm463_vm9 = vcmask 1043456   ;;  %vm436_vm10 = vcmask 900096  }
  0x2f   : > { %s912_s29 = smov 94   ;;  %s916_s8 = smov 95   ;;  %vm427_vm11 = vcmask 908288   ;;  %vm445_vm12 = vcmask 785408   ;;  %vm452_vm13 = vcmask 777216   ;;  %vm461_vm14 = vcmask 769024  }
  0x30   : > { %v357_v7 = vrot.slane %v348_v4, %v356_v5  ;;  %v1009_v9 = vrot.slane %v348_v4, %v351_v6  ;;  %vm473_vm15 = vcmask 293888  }
  0x31   : > { %v1007_v8 = vld [vmem:[%s280_s13] sm:$0xff]  ;;  %s904_s13 = smov 34  }
  0x32   : > { %359 = vrot.lane.b32.xlu0 %v357_v7, %s900_s16  ;;  %374 = vrot.lane.b32.xlu1 %v357_v7, %s901_s12  ;;  %v396_v10 = vcombine.low %v1007_v8, %v1007_v8  ;;  %v422_v11 = vcombine.high %v1007_v8, %v1007_v8  ;;  %v353_v55 = vmul.f32 %v1009_v9, %v1007_v8 }
  0x34   : > { %v820_v12 = vpack.i.bf16 %v1007_v8, %v396_v10  ;;  %v825_v13 = vpack.i.bf16 %v422_v11, %v1007_v8 }
  0x36   : > { %367 = vrot.lane.b32.xlu0 %v1009_v9, %s902_s14  ;;  %381 = vrot.lane.b32.xlu1 %v1009_v9, %s903_s22 }
  0x3a   : > { %388 = vrot.lane.b32.xlu0 %v357_v7, %s904_s13  ;;  %821 = vrot.lane.b32.xlu1 %v820_v12, %s905_s23 }
  0x3e   : > { %826 = vrot.lane.b32.xlu0 %v825_v13, %s906_s24 }
  0xa4   : > { %v360_v14 = vpop.permute.xlu0 %359  ;;  %v375_v15 = vpop.permute.xlu1 %374 }
  0xa5   : > { %v361_v16 = vrot.slane %v360_v14, 4  ;;  %v376_v17 = vrot.slane %v375_v15, 4 }
  0xa7   : > { %v363_v18 = vsel %vm362_vm0, %v361_v16, %v360_v14  ;;  %v378_v22 = vsel %vm377_vm1, %v376_v17, %v375_v15 }
  0xa8   : > { %v365_v19 = vmul.f32 %v363_v18, %v1007_v8  ;;  %v368_v20 = vpop.permute.xlu0 %367  ;;  %v382_v21 = vpop.permute.xlu1 %381  ;;  %v380_v29 = vmul.f32 %v378_v22, %v1007_v8 }
  0xa9   : > { %v369_v23 = vrot.slane %v368_v20, 4  ;;  %v383_v24 = vrot.slane %v382_v21, 4 }
  0xaa   : > { %v405_v25 = vcombine.high %v365_v19, %v365_v19  ;;  %v431_v37 = vcombine.low %v380_v29, %v380_v29 }
  0xab   : > { %v371_v27 = vsel %vm370_vm2, %v369_v23, %v368_v20  ;;  %v385_v28 = vsel %vm384_vm3, %v383_v24, %v382_v21  ;;  %v346_v20 = vld [vmem:[%s1056_s1] sm:$0xff] }
  0xac   : > { %v373_v30 = vmul.f32 %v371_v27, %v1007_v8  ;;  %v387_v31 = vmul.f32 %v385_v28, %v1007_v8  ;;  %v830_v32 = vpack.i.bf16 %v405_v25, %v365_v19  ;;  %v389_v33 = vpop.permute.xlu0 %388  ;;  %v840_v41 = vpack.i.bf16 %v380_v29, %v431_v37  ;;  %v822_v48 = vpop.permute.xlu1 %821 }
  0xad   : > { %v390_v34 = vrot.slane %v389_v33, 4  ;;  %v824_v50 = vunpack.i.h.bf16 %v822_v48  ;;  %v823_v51 = vunpack.i.l.bf16 %v822_v48 }
  0xae   : > { %v414_v35 = vcombine.low %v373_v30, %v373_v30  ;;  %v440_v36 = vcombine.high %v387_v31, %v387_v31  ;;  %831 = vrot.lane.b32.xlu0 %v830_v32, %s908_s25 }
  0xaf   : > { %v392_v40 = vsel %vm391_vm4, %v390_v34, %v389_v33  ;;  %v402_v58 = vsel %vm401_vm6, %v823_v51, %v824_v50 }
  0xb0   : > { %v835_v38 = vpack.i.bf16 %v373_v30, %v414_v35  ;;  %v845_v39 = vpack.i.bf16 %v440_v36, %v387_v31  ;;  %v394_v42 = vmul.f32 %v392_v40, %v1007_v8  ;;  %v827_v47 = vpop.permute.xlu0 %826  ;;  %v464_v63 = vsel %vm463_vm9, %v353_v55, %v402_v58 }
  0xb1   : > { %v829_v4 = vunpack.i.h.bf16 %v827_v47  ;;  %v828_v5 = vunpack.i.l.bf16 %v827_v47 }
  0xb2   : > { %836 = vrot.lane.b32.xlu1 %v835_v38, %s909_s26  ;;  %846 = vrot.lane.b32.xlu0 %v845_v39, %s910_s27  ;;  %v456_v46 = vcombine.high %v394_v42, %v394_v42 }
  0xb6   : > { %841 = vrot.lane.b32.xlu1 %v840_v41, %s911_s28  ;;  %457 = vrot.lane.b32.xlu0 %v394_v42, %s912_s29 }
  0xba   : > { %851 = vrot.lane.b32.xlu1 %v820_v12, %s916_s8  ;;  %470 = vperm.xlu0 %855, %v347_v44   ;;  %v428_v12 = vsel %vm427_vm11, %v828_v5, %v829_v4 }
  0xbe   : > { %459 = vrot.lane.b32.xlu1 %v456_v46, %s912_s29 }
 0x120   : > { %v832_v49 = vpop.permute.xlu0 %831 }
 0x121   : > { %v834_v52 = vunpack.i.h.bf16 %v832_v49  ;;  %v833_v53 = vunpack.i.l.bf16 %v832_v49 }
 0x123   : > { %v411_v59 = vsel %vm410_vm7, %v833_v53, %v834_v52 }
 0x124   : > { %v837_v54 = vpop.permute.xlu1 %836  ;;  %v847_v62 = vpop.permute.xlu0 %846 }
 0x125   : > { %v839_v56 = vunpack.i.h.bf16 %v837_v54  ;;  %v838_v57 = vunpack.i.l.bf16 %v837_v54  ;;  %v849_v6 = vunpack.i.h.bf16 %v847_v62  ;;  %v848_v7 = vunpack.i.l.bf16 %v847_v62 }
 0x127   : > { %v420_v60 = vsel %vm419_vm8, %v838_v57, %v839_v56  ;;  %v446_v13 = vsel %vm445_vm12, %v848_v7, %v849_v6 }
 0x128   : > { %v842_v61 = vpop.permute.xlu1 %841  ;;  %v465_v0 = vsel %vm463_vm9, %v411_v59, %v420_v60  ;;  %v458_v19 = vpop.permute.xlu0 %457 }
 0x129   : > { %v844_v1 = vunpack.i.h.bf16 %v842_v61  ;;  %v843_v2 = vunpack.i.l.bf16 %v842_v61  ;;  %v758_v3 = vpack.c.bf16 %v465_v0, %v464_v63 }
 0x12b   : > { %759 = vmatpush3.bf16.msra.mxu0 %v758_v3  ;;  %v437_v9 = vsel %vm436_vm10, %v843_v2, %v844_v1 }
 0x12c   : > { %v852_v8 = vpop.permute.xlu1 %851  ;;  %760 = vmatprep.subr.bf16.mxu0 %v907_v26  ;;  %v466_v15 = vsel %vm463_vm9, %v428_v12, %v437_v9 }
 0x12d   : > { %v854_v10 = vunpack.i.h.bf16 %v852_v8  ;;  %v853_v11 = vunpack.i.l.bf16 %v852_v8 }
 0x12f   : > { %v453_v14 = vsel %vm452_vm13, %v853_v11, %v854_v10 }
 0x130   : > { %v467_v16 = vsel %vm463_vm9, %v446_v13, %v453_v14  ;;  %v460_v18 = vpop.permute.xlu1 %459 }
 0x131   : > { %v761_v17 = vpack.c.bf16 %v467_v16, %v466_v15  ;;  %v462_v21 = vsel %vm461_vm14, %v458_v19, %v460_v18 }
 0x133   : > { %762 = vmatpush3.bf16.msra.mxu0 %v761_v17 }
 0x134   : > { %752 = vmatprep.subr.mxu0 %v914_v43 }
 0x137   : > { %753 = vmatpush3.msk.msra.mxu0 %vm463_vm9, %v462_v21 }
 0x138   : > { %755 = vmatmul.mubr.msk.f32.vlgmr.msra.gmra.mrb[0].mxu0 %vm473_vm15, %v346_v20 }
 0x139   : > { %v471_v22 = vpop.permute.xlu0 %470 }
 0x20b   : > { %v545_v23 = vpop.f32.mrb[0].mxu0 }
 0x20c   : > { %v546_v24 = vadd.f32 %v545_v23, %v471_v22  ;;  %v756_v25 = vpop.f32.mrb[1].mxu0 }
 0x20e   : > { %549 = vst [vmem:[%s986_s7] sm:$0xff] %v546_v24 }
 0x20f PF: > { %s14_s19 = sadd.s32 1, %s898_s19   ;;  %s1060_s15 = smov %s890_s17 }
 0x210   : > { %p11_p10 = scmp.ge.s32.totalorder %s14_s19, 6   ;;  %s1061_s16 = smov %s894_s18 }
 0x211   : > { %s1062_s17 = smov %s1065_s20  ;;  %s1063_s18 = smov %s1069_s21 }
 0x212   :  { %13 = sbr.rel (!%p11_p10) target bundleno = 3 (0x3), region = 164 }
 0x219   :  { %585 = vsyncmov [#allocation3] }
 0x21c   :  { %s586_s7 = vpop.sfrf %585 }
 0x21d   :  { %p731_p11 = scmp.ne.s32.totalorder %s586_s7, 0 }
 0x21f   :  { %590 = shalt.err (%p731_p11)  }
 0x220   :  { %592 = vsyncmov [#allocation3 + $0x1] }
 0x223   :  { %s593_s11 = vpop.sfrf %592 }
 0x224   :  { %p732_p12 = scmp.ne.s32.totalorder %s593_s11, 0 }
 0x226   :  { %597 = shalt.err (%p732_p12)  }

</bundles_post_ra>
